<compile_context>
chip_gen: v5e
topology: v5e:2x2
jax: 0.10.0
libtpu: 0.0.40
codegen_flags: <defaults>
</compile_context>

<pallas_src>
import functools

import jax
import jax.numpy as jnp
from jax.experimental import pallas as pl
from jax.experimental.pallas import tpu as pltpu

_MIB = 1024 * 1024
_VPU_CIN_THRESHOLD = 8  # contraction dims <= this are done on the VPU


def _round_up(x, m):
    return ((x + m - 1) // m) * m


def _cdiv(a, b):
    return -(-a // b)


def _make_encoder_kernel(nb_layers, vpu_cin_threshold=_VPU_CIN_THRESHOLD):
    """Fused encoder kernel.

    Kernel signature (built by pallas_call):
        kernel(x_ref, w0, b0, w1, b1, ..., o_ref)
      x_ref : (1, Cin0, tm)   f32, pixels on the lane axis
      w_l   : (Cout_l, Cin_l) f32 (tiny layers) or bf16 (MXU layers), resident
      b_l   : (Cout_l, 1)     f32, resident
      o_ref : (1, Cout_last, tm) f32
    """

    def kernel(x_ref, *refs):
        o_ref = refs[-1]
        wb_refs = refs[:-1]

        h = x_ref[0]                                 # (Cin0, tm) f32
        for li in range(nb_layers):
            w = wb_refs[2 * li][...]                 # (Cout, Cin)
            b = wb_refs[2 * li + 1][...]             # (Cout, 1) f32
            cin = w.shape[1]
            if cin <= vpu_cin_threshold:
                # Tiny contraction dim (e.g. Cin = nb_channels = 4): a K=4
                # matmul would fill only a sliver of the MXU, so do `cin`
                # broadcast FMAs on the VPU instead, in f32 (v5e has no bf16
                # VALU anyway).
                hf = h.astype(jnp.float32)
                wf = w.astype(jnp.float32)
                acc = wf[:, 0:1] * hf[0:1, :]
                for c in range(1, cin):
                    acc = acc + wf[:, c:c + 1] * hf[c:c + 1, :]
            else:
                # MXU path: bf16 operands, f32 accumulation.
                acc = jnp.dot(w, h.astype(w.dtype),
                              preferred_element_type=jnp.float32)
            # Bias + ReLU in f32 (next layer casts to bf16 at its jnp.dot).
            h = jnp.maximum(acc + b, 0.0)

        o_ref[0] = h.astype(o_ref.dtype)

    return kernel


def _vmem_estimate_bytes(c_in, c_final, dims, tm, weight_bytes):
    """Rough peak-VMEM model: resident weights + double-buffered I/O blocks +
    the two widest live (channels, tm) f32 intermediates."""
    widest = max(max(co for _, co in dims), max(ci for ci, _ in dims))
    io = 2 * (c_in + c_final) * tm * 4      # double-buffered in/out tiles
    inter = 2 * widest * tm * 4             # f32 acc + previous activation
    return weight_bytes + io + inter


@functools.partial(jax.jit, static_argnames=("tm_target",))
def encoder_forward(x_nchw, params, tm_target=4096):
    """x_nchw: (N, C, H, W) f32 -> (N, nb_features, H, W) f32."""
    N, C, H, W = x_nchw.shape
    HW = H * W
    nb_layers = len(params)
    dims = [(w.shape[1], w.shape[0]) for (w, _) in params]   # (Cin, Cout)
    c_final = dims[-1][1]

    # Pixels-on-lanes layout: (N, C, H*W). No transposes, no padding.
    x = x_nchw.reshape(N, C, HW)

    # ---- Pixel tile selection -------------------------------------------
    # Start from a large lane-dense tile, then auto-shrink to (a) fit a
    # conservative VMEM budget (v7x: 64 MiB/TC) and (b) give >= 2 grid steps
    # so both v7x TensorCores get work.
    tm = min(tm_target, _round_up(HW, 128))
    tm = max(128, (tm // 128) * 128)

    weight_bytes = 0
    for li, (w, b) in enumerate(params):
        wb = 2 if dims[li][0] > _VPU_CIN_THRESHOLD else 4  # bf16 vs f32
        weight_bytes += w.size * wb + b.size * 4

    VMEM_BUDGET = 36 * _MIB
    while tm > 128 and _vmem_estimate_bytes(C, c_final, dims, tm,
                                            weight_bytes) > VMEM_BUDGET:
        tm = max(128, ((tm // 2) // 128) * 128)
    while tm > 128 and N * _cdiv(HW, tm) < 2:
        tm = max(128, ((tm // 2) // 128) * 128)

    grid = (N, _cdiv(HW, tm))   # partial last pixel block is masked by Pallas

    # ---- Flatten params; resident (un-blocked) VMEM weights --------------
    flat_params = []
    in_specs = [pl.BlockSpec((1, C, tm), lambda n, j: (n, 0, j))]
    for li, (w, b) in enumerate(params):
        if dims[li][0] > _VPU_CIN_THRESHOLD:
            w = w.astype(jnp.bfloat16)              # bf16 MXU operand
        flat_params.append(w)                       # (Cout, Cin)
        flat_params.append(b.reshape(b.shape[0], 1).astype(jnp.float32))
        in_specs.append(pl.BlockSpec(memory_space=pltpu.MemorySpace.VMEM))
        in_specs.append(pl.BlockSpec(memory_space=pltpu.MemorySpace.VMEM))

    total_pixels = N * HW
    flops = 2 * total_pixels * sum(ci * co for (ci, co) in dims)
    bytes_accessed = (4 * N * HW * (C + c_final)
                      + sum(w.size + b.size for (w, b) in params) * 4)

    est = _vmem_estimate_bytes(C, c_final, dims, tm, weight_bytes)
    vmem_limit = int(min(48 * _MIB, max(32 * _MIB, 2 * est)))

    out = pl.pallas_call(
        _make_encoder_kernel(nb_layers),
        out_shape=jax.ShapeDtypeStruct((N, c_final, HW), jnp.float32),
        grid_spec=pltpu.PrefetchScalarGridSpec(
            num_scalar_prefetch=0,
            grid=grid,
            in_specs=in_specs,
            out_specs=pl.BlockSpec((1, c_final, tm), lambda n, j: (n, 0, j)),
        ),
        compiler_params=pltpu.CompilerParams(
            dimension_semantics=("parallel", "parallel"),
            vmem_limit_bytes=vmem_limit,
        ),
        cost_estimate=pl.CostEstimate(
            flops=flops, transcendentals=0, bytes_accessed=bytes_accessed),
    )(x, *flat_params)

    return out.reshape(N, c_final, H, W)


def init_encoder_params(key, nb_channels, nb_features, nb_layers):
    """Deterministic init matching the layer shapes of Encoder.build().

    Weights are stored (Cout, Cin) — the squeezed PyTorch Conv2d 1x1 layout.
    """
    dims = []
    in_channels = nb_channels
    out_channels = 64
    for _ in range(nb_layers - 1):
        dims.append((in_channels, out_channels))
        in_channels = out_channels
        out_channels = 2 * out_channels
    dims.append((in_channels, nb_features))

    params = []
    for (cin, cout) in dims:
        key, kw, kb = jax.random.split(key, 3)
        bound = 1.0 / jnp.sqrt(jnp.asarray(cin, jnp.float32))
        w = jax.random.uniform(kw, (cout, cin), jnp.float32, -bound, bound)
        b = jax.random.uniform(kb, (cout,), jnp.float32, -bound, bound)
        params.append((w, b))
    return params


def encoder_reference(x_nchw, params):
    """Plain-JAX reference (1x1 conv == per-pixel linear) for validation."""
    r = x_nchw
    for (w, b) in params:
        r = jnp.einsum("oc,nchw->nohw", w, r,
                       precision=jax.lax.Precision.HIGHEST)
        r = jnp.maximum(r + b.reshape(1, -1, 1, 1), 0.0)
    return r


if __name__ == "__main__":
    nb_channels = 4
    nb_features = 32
    nb_layers = 3  # conv(4->64)+ReLU, conv(64->128)+ReLU, conv(128->32)+ReLU

    key = jax.random.PRNGKey(0)
    key, kx = jax.random.split(key)
    x = jax.random.normal(kx, (2, nb_channels, 16, 16), jnp.float32)

    params = init_encoder_params(key, nb_channels, nb_features, nb_layers)

    out = encoder_forward(x, params)
    jax.block_until_ready(out)

    assert out.shape == (2, nb_features, 16, 16), out.shape
    assert out.dtype == jnp.float32
    # ReLU output must be non-negative
    assert bool(jnp.all(out >= 0.0))

    ref = encoder_reference(x, params)
    max_err = float(jnp.max(jnp.abs(out - ref)))
    # bf16 MXU operands with f32 accumulation vs HIGHEST-precision f32 ref.
    assert max_err < 2e-2, f"max abs err vs reference: {max_err}"

    print("KERNEL_OK")
</pallas_src>

<mosaic_0001>
module attributes {stable_mosaic.version = 11 : i64} {
  func.func @kernel(%arg0: i32, %arg1: i32, %arg2: memref<1x4x256xf32, #tpu.memory_space<vmem>>, %arg3: memref<64x4xf32, #tpu.memory_space<vmem>>, %arg4: memref<64x1xf32, #tpu.memory_space<vmem>>, %arg5: memref<128x64xbf16, #tpu.memory_space<vmem>>, %arg6: memref<128x1xf32, #tpu.memory_space<vmem>>, %arg7: memref<32x128xbf16, #tpu.memory_space<vmem>>, %arg8: memref<32x1xf32, #tpu.memory_space<vmem>>, %arg9: memref<1x32x256xf32, #tpu.memory_space<vmem>>) attributes {dimension_semantics = [#tpu.dimension_semantics<parallel>, #tpu.dimension_semantics<parallel>], iteration_bounds = array<i64: 2, 1>, scalar_prefetch = 0 : i64, scratch_operands = 0 : i64, tpu.core_type = #tpu.core_type<tc>, window_params = [{transform_indices = @transform_0, window_bounds = array<i64: 1, 4, 256>}, {pipeline_mode = #tpu.pipeline_mode<synchronous>, transform_indices = @transform_1, window_bounds = array<i64: 64, 4>}, {pipeline_mode = #tpu.pipeline_mode<synchronous>, transform_indices = @transform_2, window_bounds = array<i64: 64, 1>}, {pipeline_mode = #tpu.pipeline_mode<synchronous>, transform_indices = @transform_3, window_bounds = array<i64: 128, 64>}, {pipeline_mode = #tpu.pipeline_mode<synchronous>, transform_indices = @transform_4, window_bounds = array<i64: 128, 1>}, {pipeline_mode = #tpu.pipeline_mode<synchronous>, transform_indices = @transform_5, window_bounds = array<i64: 32, 128>}, {pipeline_mode = #tpu.pipeline_mode<synchronous>, transform_indices = @transform_6, window_bounds = array<i64: 32, 1>}, {transform_indices = @transform_7, window_bounds = array<i64: 1, 32, 256>}]} {
    %c0 = arith.constant 0 : index
    %c0_0 = arith.constant 0 : index
    %c0_1 = arith.constant 0 : index
    %0 = vector.load %arg2[%c0, %c0_0, %c0_1] : memref<1x4x256xf32, #tpu.memory_space<vmem>>, vector<1x4x256xf32>
    %1 = vector.shape_cast %0 : vector<1x4x256xf32> to vector<4x256xf32>
    %c0_2 = arith.constant 0 : index
    %c0_3 = arith.constant 0 : index
    %2 = vector.load %arg3[%c0_2, %c0_3] : memref<64x4xf32, #tpu.memory_space<vmem>>, vector<64x4xf32>
    %c0_4 = arith.constant 0 : index
    %c0_5 = arith.constant 0 : index
    %3 = vector.load %arg4[%c0_4, %c0_5] : memref<64x1xf32, #tpu.memory_space<vmem>>, vector<64x1xf32>
    %4 = vector.extract_strided_slice %2 {offsets = [0, 0], sizes = [64, 1], strides = [1, 1]} : vector<64x4xf32> to vector<64x1xf32>
    %5 = vector.extract_strided_slice %1 {offsets = [0, 0], sizes = [1, 256], strides = [1, 1]} : vector<4x256xf32> to vector<1x256xf32>
    %6 = vector.broadcast %4 : vector<64x1xf32> to vector<64x256xf32>
    %7 = vector.broadcast %5 : vector<1x256xf32> to vector<64x256xf32>
    %8 = arith.mulf %6, %7 : vector<64x256xf32>
    %9 = vector.extract_strided_slice %2 {offsets = [0, 1], sizes = [64, 1], strides = [1, 1]} : vector<64x4xf32> to vector<64x1xf32>
    %10 = vector.extract_strided_slice %1 {offsets = [1, 0], sizes = [1, 256], strides = [1, 1]} : vector<4x256xf32> to vector<1x256xf32>
    %11 = vector.broadcast %9 : vector<64x1xf32> to vector<64x256xf32>
    %12 = vector.broadcast %10 : vector<1x256xf32> to vector<64x256xf32>
    %13 = arith.mulf %11, %12 : vector<64x256xf32>
    %14 = arith.addf %8, %13 : vector<64x256xf32>
    %15 = vector.extract_strided_slice %2 {offsets = [0, 2], sizes = [64, 1], strides = [1, 1]} : vector<64x4xf32> to vector<64x1xf32>
    %16 = vector.extract_strided_slice %1 {offsets = [2, 0], sizes = [1, 256], strides = [1, 1]} : vector<4x256xf32> to vector<1x256xf32>
    %17 = vector.broadcast %15 : vector<64x1xf32> to vector<64x256xf32>
    %18 = vector.broadcast %16 : vector<1x256xf32> to vector<64x256xf32>
    %19 = arith.mulf %17, %18 : vector<64x256xf32>
    %20 = arith.addf %14, %19 : vector<64x256xf32>
    %21 = vector.extract_strided_slice %2 {offsets = [0, 3], sizes = [64, 1], strides = [1, 1]} : vector<64x4xf32> to vector<64x1xf32>
    %22 = vector.extract_strided_slice %1 {offsets = [3, 0], sizes = [1, 256], strides = [1, 1]} : vector<4x256xf32> to vector<1x256xf32>
    %23 = vector.broadcast %21 : vector<64x1xf32> to vector<64x256xf32>
    %24 = vector.broadcast %22 : vector<1x256xf32> to vector<64x256xf32>
    %25 = arith.mulf %23, %24 : vector<64x256xf32>
    %26 = arith.addf %20, %25 : vector<64x256xf32>
    %27 = vector.broadcast %3 : vector<64x1xf32> to vector<64x256xf32>
    %28 = arith.addf %26, %27 : vector<64x256xf32>
    %cst = arith.constant 0.000000e+00 : f32
    %29 = vector.broadcast %cst : f32 to vector<64x256xf32>
    %30 = arith.maximumf %28, %29 : vector<64x256xf32>
    %c0_6 = arith.constant 0 : index
    %c0_7 = arith.constant 0 : index
    %31 = vector.load %arg5[%c0_6, %c0_7] : memref<128x64xbf16, #tpu.memory_space<vmem>>, vector<128x64xbf16>
    %c0_8 = arith.constant 0 : index
    %c0_9 = arith.constant 0 : index
    %32 = vector.load %arg6[%c0_8, %c0_9] : memref<128x1xf32, #tpu.memory_space<vmem>>, vector<128x1xf32>
    %33 = arith.truncf %30 : vector<64x256xf32> to vector<64x256xbf16>
    %cst_10 = arith.constant dense<0.000000e+00> : vector<128x256xf32>
    %34 = tpu.matmul %31, %33, %cst_10 {dimension_numbers = #tpu.dot_dimension_numbers<[1], [0], [0], [1], [0, 0, 1, 1], [], []>} : vector<128x64xbf16>, vector<64x256xbf16>, vector<128x256xf32> -> vector<128x256xf32>
    %35 = vector.broadcast %32 : vector<128x1xf32> to vector<128x256xf32>
    %36 = arith.addf %34, %35 : vector<128x256xf32>
    %cst_11 = arith.constant 0.000000e+00 : f32
    %37 = vector.broadcast %cst_11 : f32 to vector<128x256xf32>
    %38 = arith.maximumf %36, %37 : vector<128x256xf32>
    %c0_12 = arith.constant 0 : index
    %c0_13 = arith.constant 0 : index
    %39 = vector.load %arg7[%c0_12, %c0_13] : memref<32x128xbf16, #tpu.memory_space<vmem>>, vector<32x128xbf16>
    %c0_14 = arith.constant 0 : index
    %c0_15 = arith.constant 0 : index
    %40 = vector.load %arg8[%c0_14, %c0_15] : memref<32x1xf32, #tpu.memory_space<vmem>>, vector<32x1xf32>
    %41 = arith.truncf %38 : vector<128x256xf32> to vector<128x256xbf16>
    %cst_16 = arith.constant dense<0.000000e+00> : vector<32x256xf32>
    %42 = tpu.matmul %39, %41, %cst_16 {dimension_numbers = #tpu.dot_dimension_numbers<[1], [0], [0], [1], [0, 0, 1, 1], [], []>} : vector<32x128xbf16>, vector<128x256xbf16>, vector<32x256xf32> -> vector<32x256xf32>
    %43 = vector.broadcast %40 : vector<32x1xf32> to vector<32x256xf32>
    %44 = arith.addf %42, %43 : vector<32x256xf32>
    %cst_17 = arith.constant 0.000000e+00 : f32
    %45 = vector.broadcast %cst_17 : f32 to vector<32x256xf32>
    %46 = arith.maximumf %44, %45 : vector<32x256xf32>
    %c0_18 = arith.constant 0 : index
    %c0_19 = arith.constant 0 : index
    %c0_20 = arith.constant 0 : index
    %47 = vector.load %arg9[%c0_18, %c0_19, %c0_20] : memref<1x32x256xf32, #tpu.memory_space<vmem>>, vector<1x32x256xf32>
    %48 = vector.shape_cast %47 : vector<1x32x256xf32> to vector<32x256xf32>
    %49 = vector.shape_cast %46 : vector<32x256xf32> to vector<1x32x256xf32>
    tpu.vector_store %arg9[%c0_18, %c0_19, %c0_20], %49 {strides = array<i32>} : memref<1x32x256xf32, #tpu.memory_space<vmem>>, vector<1x32x256xf32>,
    return
  }
  func.func @transform_0(%arg0: i32, %arg1: i32) -> (i32, i32, i32) {
    %c0_i32 = arith.constant 0 : i32
    %c0_i32_0 = arith.constant 0 : i32
    return %arg0, %c0_i32, %arg1 : i32, i32, i32
  }
  func.func @transform_1(%arg0: i32, %arg1: i32) -> (i32, i32) {
    %c0_i32 = arith.constant 0 : i32
    %c0_i32_0 = arith.constant 0 : i32
    %c0_i32_1 = arith.constant 0 : i32
    return %c0_i32, %c0_i32_0 : i32, i32
  }
  func.func @transform_2(%arg0: i32, %arg1: i32) -> (i32, i32) {
    %c0_i32 = arith.constant 0 : i32
    %c0_i32_0 = arith.constant 0 : i32
    %c0_i32_1 = arith.constant 0 : i32
    return %c0_i32, %c0_i32_0 : i32, i32
  }
  func.func @transform_3(%arg0: i32, %arg1: i32) -> (i32, i32) {
    %c0_i32 = arith.constant 0 : i32
    %c0_i32_0 = arith.constant 0 : i32
    %c0_i32_1 = arith.constant 0 : i32
    return %c0_i32, %c0_i32_0 : i32, i32
  }
  func.func @transform_4(%arg0: i32, %arg1: i32) -> (i32, i32) {
    %c0_i32 = arith.constant 0 : i32
    %c0_i32_0 = arith.constant 0 : i32
    %c0_i32_1 = arith.constant 0 : i32
    return %c0_i32, %c0_i32_0 : i32, i32
  }
  func.func @transform_5(%arg0: i32, %arg1: i32) -> (i32, i32) {
    %c0_i32 = arith.constant 0 : i32
    %c0_i32_0 = arith.constant 0 : i32
    %c0_i32_1 = arith.constant 0 : i32
    return %c0_i32, %c0_i32_0 : i32, i32
  }
  func.func @transform_6(%arg0: i32, %arg1: i32) -> (i32, i32) {
    %c0_i32 = arith.constant 0 : i32
    %c0_i32_0 = arith.constant 0 : i32
    %c0_i32_1 = arith.constant 0 : i32
    return %c0_i32, %c0_i32_0 : i32, i32
  }
  func.func @transform_7(%arg0: i32, %arg1: i32) -> (i32, i32, i32) {
    %c0_i32 = arith.constant 0 : i32
    %c0_i32_0 = arith.constant 0 : i32
    return %arg0, %c0_i32, %arg1 : i32, i32, i32
  }
}

</mosaic_0001>

<bundles_post_ra>
// kernel: encoder_forward.1
= control target key start
LH: loop header
LB: loop body
LE: loop exit
PB: predicated region body
PF: predicated region fallthrough
CT: control target
= control target key end

     0   :  { %s1406_s24 = smov 0   ;;  %s1408_s25 = smov 0   ;;  %s1870_s0 = inlined_call_operand.vmem [shape: f32[2,4,256], index: 0, kind: input, shape index: {}]   ;;  %s1871_s1 = inlined_call_operand.vmem [shape: f32[64,4], index: 1, kind: input, shape index: {}]   ;;  %s1872_s2 = inlined_call_operand.vmem [shape: f32[64,1], index: 2, kind: input, shape index: {}]   ;;  %s1873_s3 = inlined_call_operand.vmem [shape: bf16[128,64], index: 3, kind: input, shape index: {}]   ;;  %s1874_s4 = inlined_call_operand.vmem [shape: f32[128,1], index: 4, kind: input, shape index: {}]   ;;  %s1875_s5 = inlined_call_operand.vmem [shape: bf16[32,128], index: 5, kind: input, shape index: {}]   ;;  %s1876_s6 = inlined_call_operand.vmem [shape: f32[32,1], index: 6, kind: input, shape index: {}]   ;;  %s1877_s7 = inlined_call_operand.vmem [shape: f32[2,32,256], index: 7, kind: output, shape index: {}]  }
   0x1   :  { %s1410_s26 = smov 0  }
   0x2 LB: > { %s29_s27 = sadd.s32 1, %s1356_s25  ;;  %p1197_p0 = scmp.ge.s32.totalorder %s1360_s26, 1  ;;  %s1360_s26 = sphi %s1410_s26, %s17_s26   ;;  %s1356_s25 = sphi %s1408_s25, %s1879_s25   ;;  %s1352_s24 = sphi %s1406_s24, %s1878_s24  }
   0x3   : > { %p31_p1 = scmp.ge.s32.totalorder %s29_s27, 2  ;;  %p258_p2 = scmp.lt.s32.totalorder %s1360_s26, 3 }
   0x5   : > { %s1881_s27 = smov (%p31_p1, %s29_s27), 0  ;;  %p259_p3 = pnand %p1197_p0, %p258_p2 }
   0x6   : > { %p299_p4 = scmp.lt.s32.totalorder (!%p259_p3), %s1352_s24, 1 }
   0x7   : > { %262 = sbr.rel (%p259_p3) target bundleno = 669 (0x29d), region = 48 }
   0xc   : > { %v326_v0 = vld [vmem:[%s1871_s1 + $0x30] sm:$0xff]  ;;  %v325_v1 = vld [vmem:[%s1871_s1 + $0x28] sm:$0xff]  ;;  %v1362_v2 = vmov 2   ;;  %v1363_v3 = vmov 1   ;;  %v327_v4 = vld [vmem:[%s1871_s1 + $0x38] sm:$0xff]  ;;  %v1364_v5 = vmov 3  }
   0xd   : > { %1309 = vset.pattern.permute.xlu2 %v1362_v2  ;;  %1312 = vset.pattern.permute.xlu0 %v1363_v3  ;;  %v324_v6 = vld [vmem:[%s1871_s1 + $0x20] sm:$0xff]  ;;  %v323_v7 = vld [vmem:[%s1871_s1 + $0x18] sm:$0xff]  ;;  %v1365_v8 = vmov 0   ;;  %v322_v10 = vld [vmem:[%s1871_s1 + $0x10] sm:$0xff]  ;;  %s1883_s24 = smov (!%p299_p4, %s1352_s24), 1  ;;  %vm841_vm0 = vcmask 523264  }
   0xe   : > { %1308 = vset.pattern.permute.xlu1 %v1363_v3  ;;  %494 = vperm.xlu2 %1309, %v326_v0   ;;  %v1450_v9 = vld [vmem:[%s1871_s1] sm:$0xff]  ;;  %v334_v11 = vld [vmem:[%s1872_s2 + $0x30] sm:$0xff]  ;;  %v335_v12 = vld [vmem:[%s1872_s2 + $0x38] sm:$0xff]  ;;  %s1260_s28 = sshll.u32 %s1883_s24, 3  ;;  %s1261_s29 = sshll.u32 %s1883_s24, 6 }
   0xf   : > { %424 = vperm.xlu1 %1308, %v326_v0   ;;  %420 = vperm.xlu0 %1312, %v325_v1   ;;  %v331_v13 = vld [vmem:[%s1872_s2 + $0x18] sm:$0xff]  ;;  %v321_v14 = vld [vmem:[%s1871_s1 + $0x8] sm:$0xff]  ;;  %v709_v15 = vld [vmem:[%s1874_s4 + $0x60] sm:$0xff]  ;;  %s306_s8 = scalar_lea.vmem %s1870_s0, %s1260_s28  ;;  %s1851_s9 = scalar_lea.vmem %s1877_s7, %s1261_s29 }
  0x10   : > { %v708_v16 = vld [vmem:[%s1874_s4 + $0x58] sm:$0xff]  ;;  %v332_v18 = vld [vmem:[%s1872_s2 + $0x20] sm:$0xff]  ;;  %v703_v19 = vld [vmem:[%s1874_s4 + $0x30] sm:$0xff] }
  0x11   : > { %v333_v20 = vld [vmem:[%s1872_s2 + $0x28] sm:$0xff]  ;;  %v697_v24 = vld [vmem:[%s1874_s4] sm:$0xff]  ;;  %v330_v27 = vld [vmem:[%s1872_s2 + $0x10] sm:$0xff] }
  0x12   : > { %v702_v22 = vld [vmem:[%s1874_s4 + $0x28] sm:$0xff]  ;;  %v319_v30 = vld [vmem:[%s306_s8] sm:$0xff]  ;;  %v712_v54 = vld [vmem:[%s1874_s4 + $0x78] sm:$0xff] }
  0x13   : > { %v1001_v29 = vld [vmem:[%s1876_s6 + $0x8] sm:$0xff]  ;;  %v328_v34 = vld [vmem:[%s1872_s2] sm:$0xff]  ;;  %v431_v35 = vperm.slane %v319_v30, 1  ;;  %v432_v36 = vperm.slane %v319_v30, 5  ;;  %v377_v37 = vperm.slane %v319_v30, 0  ;;  %v378_v38 = vperm.slane %v319_v30, 4 }
  0x14   : > { %v329_v32 = vld [vmem:[%s1872_s2 + $0x8] sm:$0xff]  ;;  %v501_v39 = vperm.slane %v319_v30, 2  ;;  %v502_v40 = vperm.slane %v319_v30, 6  ;;  %v571_v41 = vperm.slane %v319_v30, 3  ;;  %v572_v42 = vperm.slane %v319_v30, 7  ;;  %v711_v57 = vld [vmem:[%s1874_s4 + $0x70] sm:$0xff] }
  0x15   : > { %v1548_v44 = vperm.slane %v431_v35, 1  ;;  %v1550_v45 = vperm.slane %v432_v36, 1  ;;  %v1552_v46 = vperm.slane %v377_v37, 0  ;;  %v1554_v47 = vperm.slane %v378_v38, 0 }
  0x16   : > { %498 = vperm.xlu2 %1309, %v327_v4   ;;  %v1556_v48 = vperm.slane %v501_v39, 2  ;;  %v1558_v49 = vperm.slane %v502_v40, 2  ;;  %v1562_v52 = vperm.slane %v571_v41, 3  ;;  %v1564_v53 = vperm.slane %v572_v42, 3  ;;  %v699_v39 = vld [vmem:[%s1874_s4 + $0x10] sm:$0xff] }
  0x17   : > { %428 = vperm.xlu1 %1308, %v327_v4   ;;  %1321 = vset.pattern.permute.xlu0 %v1364_v5 }
  0x18   : > { %560 = vperm.xlu0 %1321, %v325_v1  }
  0x1e   : > { %1311 = vset.pattern.permute.xlu2 %v1363_v3 }
  0x1f   : > { %1310 = vset.pattern.permute.xlu1 %v1365_v8  ;;  %416 = vperm.xlu2 %1311, %v324_v6  }
  0x20   : > { %363 = vperm.xlu1 %1310, %v325_v1   ;;  %552 = vperm.xlu0 %1321, %v323_v7  }
  0x27   : > { %1314 = vset.pattern.permute.xlu2 %v1364_v5 }
  0x28   : > { %1313 = vset.pattern.permute.xlu1 %v1364_v5  ;;  %540 = vperm.xlu0 %1321, %v1450_v9  }
  0x29   : > { %564 = vperm.xlu1 %1313, %v326_v0   ;;  %568 = vperm.xlu2 %1314, %v327_v4  }
  0x30   : > { %1334 = vset.pattern.permute.xlu0 %v1365_v8 }
  0x31   : > { %1315 = vset.pattern.permute.xlu1 %v1362_v2  ;;  %1316 = vset.pattern.permute.xlu2 %v1362_v2 }
  0x32   : > { %368 = vperm.xlu0 %1334, %v326_v0   ;;  %486 = vperm.xlu1 %1315, %v324_v6  }
  0x33   : > { %490 = vperm.xlu2 %1316, %v325_v1  }
  0x3a   : > { %373 = vperm.xlu0 %1334, %v327_v4   ;;  %1317 = vset.pattern.permute.xlu1 %v1365_v8 }
  0x3b   : > { %1318 = vset.pattern.permute.xlu2 %v1363_v3  ;;  %353 = vperm.xlu1 %1317, %v323_v7  }
  0x3c   : > { %408 = vperm.xlu2 %1318, %v322_v10  }
  0x42   : > { %358 = vperm.xlu0 %1334, %v324_v6  }
  0x43   : > { %1319 = vset.pattern.permute.xlu1 %v1363_v3 }
  0x44   : > { %1320 = vset.pattern.permute.xlu2 %v1364_v5  ;;  %412 = vperm.xlu1 %1319, %v323_v7  }
  0x45   : > { %556 = vperm.xlu2 %1320, %v324_v6  }
  0x4a   : > { %348 = vperm.xlu0 %1334, %v322_v10  }
  0x4c   : > { %1322 = vset.pattern.permute.xlu1 %v1365_v8 }
  0x4d   : > { %1323 = vset.pattern.permute.xlu2 %v1365_v8  ;;  %641 = vperm.xlu1 %1322, %v334_v11  }
  0x4e   : > { %646 = vperm.xlu2 %1323, %v335_v12  }
  0x52   : > { %338 = vperm.xlu0 %1334, %v1450_v9  }
  0x55   : > { %1324 = vset.pattern.permute.xlu1 %v1362_v2 }
  0x56   : > { %1325 = vset.pattern.permute.xlu2 %v1362_v2  ;;  %478 = vperm.xlu1 %1324, %v322_v10  }
  0x57   : > { %482 = vperm.xlu2 %1325, %v323_v7  }
  0x5a   : > { %626 = vperm.xlu0 %1334, %v331_v13  }
  0x5e   : > { %1326 = vset.pattern.permute.xlu1 %v1365_v8 }
  0x5f   : > { %1327 = vset.pattern.permute.xlu2 %v1363_v3  ;;  %343 = vperm.xlu1 %1326, %v321_v14  }
  0x60   : > { %400 = vperm.xlu2 %1327, %v1450_v9  }
  0x62   : > { %783 = vperm.xlu0 %1334, %v709_v15   ;;  %v705_v15 = vld [vmem:[%s1874_s4 + $0x40] sm:$0xff] }
  0x67   : > { %1328 = vset.pattern.permute.xlu1 %v1363_v3 }
  0x68   : > { %1329 = vset.pattern.permute.xlu2 %v1364_v5  ;;  %404 = vperm.xlu1 %1328, %v321_v14   ;;  %v1493_v17 = vpop.permute.xlu2 %494 }
  0x69   : > { %548 = vperm.xlu2 %1329, %v322_v10  }
  0x6a   : > { %778 = vperm.xlu0 %1334, %v708_v16  }
  0x70   : > { %1330 = vset.pattern.permute.xlu1 %v1365_v8  ;;  %v1505_v21 = vpop.permute.xlu2 %498 }
  0x71   : > { %1331 = vset.pattern.permute.xlu2 %v1365_v8  ;;  %631 = vperm.xlu1 %1330, %v332_v18   ;;  %v521_v40 = vmul.f32 %v1556_v48, %v1505_v21 }
  0x72   : > { %753 = vperm.xlu0 %1334, %v703_v19   ;;  %636 = vperm.xlu2 %1331, %v333_v20   ;;  %v701_v20 = vld [vmem:[%s1874_s4 + $0x20] sm:$0xff] }
  0x79   : > { %1332 = vset.pattern.permute.xlu1 %v1362_v2  ;;  %v1512_v23 = vpop.permute.xlu2 %416 }
  0x7a   : > { %748 = vperm.xlu0 %1334, %v702_v22   ;;  %1333 = vset.pattern.permute.xlu2 %v1362_v2  ;;  %v704_v22 = vld [vmem:[%s1874_s4 + $0x38] sm:$0xff] }
  0x7b   : > { %470 = vperm.xlu1 %1332, %v1450_v9   ;;  %474 = vperm.xlu2 %1333, %v321_v14   ;;  %v710_v9 = vld [vmem:[%s1874_s4 + $0x68] sm:$0xff] }
  0x81   : > { %v1523_v25 = vpop.permute.xlu1 %424  ;;  %v421_v26 = vpop.permute.xlu0 %420 }
  0x82   : > { %723 = vperm.xlu0 %1334, %v697_v24   ;;  %v447_v50 = vmul.f32 %v1548_v44, %v421_v26  ;;  %v448_v51 = vmul.f32 %v1550_v45, %v421_v26  ;;  %v449_v41 = vmul.f32 %v1548_v44, %v1523_v25  ;;  %v450_v42 = vmul.f32 %v1550_v45, %v1523_v25 }
  0x83   : > { %1335 = vset.pattern.permute.xlu1 %v1364_v5  ;;  %1336 = vset.pattern.permute.xlu2 %v1365_v8  ;;  %v1531_v28 = vpop.permute.xlu2 %568  ;;  %v707_v5 = vld [vmem:[%s1874_s4 + $0x50] sm:$0xff] }
  0x84   : > { %544 = vperm.xlu1 %1335, %v321_v14   ;;  %621 = vperm.xlu2 %1336, %v330_v27   ;;  %v706_v14 = vld [vmem:[%s1874_s4 + $0x48] sm:$0xff]  ;;  %v592_v25 = vmul.f32 %v1564_v53, %v1531_v28 }
  0x89   : > { %v1539_v31 = vpop.permute.xlu1 %428 }
  0x8a   : > { %1027 = vperm.xlu0 %1334, %v1001_v29   ;;  %v561_v33 = vpop.permute.xlu0 %560  ;;  %v451_v30 = vmul.f32 %v1548_v44, %v1539_v31 }
  0x8b   : > { %v587_v62 = vmul.f32 %v1562_v52, %v561_v33  ;;  %v588_v63 = vmul.f32 %v1564_v53, %v561_v33 }
  0x8c   : > { %1337 = vset.pattern.permute.xlu1 %v1365_v8  ;;  %616 = vperm.xlu2 %1336, %v329_v32   ;;  %v452_v32 = vmul.f32 %v1550_v45, %v1539_v31  ;;  %v522_v31 = vmul.f32 %v1558_v49, %v1505_v21  ;;  %v520_v21 = vmul.f32 %v1558_v49, %v1493_v17 }
  0x8d   : > { %611 = vperm.xlu1 %1337, %v328_v34   ;;  %v491_v43 = vpop.permute.xlu2 %490  ;;  %v700_v34 = vld [vmem:[%s1874_s4 + $0x18] sm:$0xff] }
  0x8e   : > { %v517_v60 = vmul.f32 %v1556_v48, %v491_v43  ;;  %v518_v61 = vmul.f32 %v1558_v49, %v491_v43 }
  0x92   : > { %v364_v55 = vpop.permute.xlu1 %363  ;;  %v1569_v56 = vpop.permute.xlu0 %552 }
  0x93   : > { %v393_v58 = vmul.f32 %v1552_v46, %v364_v55  ;;  %v394_v59 = vmul.f32 %v1554_v47, %v364_v55 }
  0x94   : > { %798 = vperm.xlu2 %1336, %v712_v54  }
  0x95   : > { %v463_v0 = vadd.f32 %v447_v50, %v393_v58  ;;  %v464_v1 = vadd.f32 %v448_v51, %v394_v59  ;;  %793 = vperm.xlu1 %1337, %v711_v57   ;;  %v519_v58 = vmul.f32 %v1556_v48, %v1493_v17  ;;  %v591_v59 = vmul.f32 %v1562_v52, %v1531_v28 }
  0x96   : > { %v1580_v2 = vpop.permute.xlu2 %408 }
  0x97   : > { %v533_v3 = vadd.f32 %v517_v60, %v463_v0  ;;  %v534_v4 = vadd.f32 %v518_v61, %v464_v1  ;;  %v1000_v60 = vld [vmem:[%s1876_s6] sm:$0xff]  ;;  %v698_v61 = vld [vmem:[%s1874_s4 + $0x8] sm:$0xff] }
  0x99   : > { %v1585_v6 = vadd.f32 %v587_v62, %v533_v3  ;;  %v1587_v7 = vadd.f32 %v588_v63, %v534_v4 }
  0x9a   : > { %v541_v8 = vpop.permute.xlu0 %540 }
  0x9b   : > { %v565_v10 = vpop.permute.xlu1 %564  ;;  %v1593_v11 = vmul.f32 %v1562_v52, %v541_v8  ;;  %v1596_v12 = vmul.f32 %v1564_v53, %v541_v8 }
  0x9c   : > { %773 = vperm.xlu2 %1336, %v707_v5   ;;  %v589_v17 = vmul.f32 %v1562_v52, %v565_v10  ;;  %v590_v4 = vmul.f32 %v1564_v53, %v565_v10  ;;  %v1002_v10 = vld [vmem:[%s1876_s6 + $0x10] sm:$0xff] }
  0x9d   : > { %788 = vperm.xlu1 %1337, %v710_v9  }
  0x9f   : > { %v1598_v13 = vpop.permute.xlu2 %556 }
  0xa4   : > { %v369_v16 = vpop.permute.xlu0 %368  ;;  %768 = vperm.xlu2 %1336, %v706_v14   ;;  %v1606_v18 = vpop.permute.xlu1 %486 }
  0xa5   : > { %763 = vperm.xlu1 %1337, %v705_v15   ;;  %v395_v35 = vmul.f32 %v1552_v46, %v369_v16  ;;  %v396_v36 = vmul.f32 %v1554_v47, %v369_v16 }
  0xa7   : > { %v465_v50 = vadd.f32 %v449_v41, %v395_v35  ;;  %v466_v51 = vadd.f32 %v450_v42, %v396_v36 }
  0xa8   : > { %v647_v19 = vpop.permute.xlu2 %646 }
  0xa9   : > { %v535_v62 = vadd.f32 %v519_v58, %v465_v50  ;;  %v536_v63 = vadd.f32 %v520_v21, %v466_v51  ;;  %v445_v51 = vmul.f32 %v1548_v44, %v1512_v23  ;;  %v446_v21 = vmul.f32 %v1550_v45, %v1512_v23 }
  0xab   : > { %v605_v28 = vadd.f32 %v589_v17, %v535_v62  ;;  %v606_v8 = vadd.f32 %v590_v4, %v536_v63  ;;  %v515_v62 = vmul.f32 %v1556_v48, %v1606_v18 }
  0xac   : > { %v374_v24 = vpop.permute.xlu0 %373  ;;  %743 = vperm.xlu2 %1336, %v701_v20  }
  0xad   : > { %758 = vperm.xlu1 %1337, %v704_v22   ;;  %v1614_v26 = vpop.permute.xlu1 %353  ;;  %v397_v27 = vmul.f32 %v1552_v46, %v374_v24  ;;  %v398_v29 = vmul.f32 %v1554_v47, %v374_v24  ;;  %v1003_v22 = vld [vmem:[%s1876_s6 + $0x18] sm:$0xff] }
  0xae   : > { %v389_v23 = vmul.f32 %v1552_v46, %v1614_v26 }
  0xaf   : > { %v467_v37 = vadd.f32 %v451_v30, %v397_v27  ;;  %v468_v38 = vadd.f32 %v452_v32, %v398_v29 }
  0xb1   : > { %v1622_v33 = vpop.permute.xlu2 %482  ;;  %v537_v54 = vadd.f32 %v521_v40, %v467_v37  ;;  %v538_v55 = vadd.f32 %v522_v31, %v468_v38 }
  0xb3   : > { %v607_v0 = vadd.f32 %v591_v59, %v537_v54  ;;  %v608_v1 = vadd.f32 %v592_v25, %v538_v55  ;;  %v583_v59 = vmul.f32 %v1562_v52, %v1569_v56  ;;  %v441_v25 = vmul.f32 %v1548_v44, %v1580_v2 }
  0xb4   : > { %v359_v43 = vpop.permute.xlu0 %358  ;;  %738 = vperm.xlu2 %1336, %v700_v34  }
  0xb5   : > { %733 = vperm.xlu1 %1337, %v699_v39   ;;  %v663_v9 = vadd.f32 %v647_v19, %v607_v0  ;;  %v664_v14 = vadd.f32 %v647_v19, %v608_v1  ;;  %v391_v54 = vmul.f32 %v1552_v46, %v359_v43  ;;  %v392_v55 = vmul.f32 %v1554_v47, %v359_v43 }
  0xb6   : > { %v1640_v57 = vpop.permute.xlu1 %412  ;;  %v586_v43 = vmul.f32 %v1564_v53, %v1598_v13  ;;  %v390_v0 = vmul.f32 %v1554_v47, %v1614_v26  ;;  %v513_v1 = vmul.f32 %v1556_v48, %v1622_v33 }
  0xb7   : > { %v679_v29 = vmax.f32 %v663_v9, 0.0  ;;  %v680_v30 = vmax.f32 %v664_v14, 0.0  ;;  %v443_v58 = vmul.f32 %v1548_v44, %v1640_v57  ;;  %v461_v17 = vadd.f32 %v445_v51, %v391_v54 }
  0xb9   : > { %v459_v4 = vadd.f32 %v443_v58, %v389_v23 }
  0xba   : > { %v401_v3 = vpop.permute.xlu2 %400 }
  0xbb   : > { %v437_v32 = vmul.f32 %v1548_v44, %v401_v3  ;;  %v438_v34 = vmul.f32 %v1550_v45, %v401_v3 }
  0xbc   : > { %v349_v5 = vpop.permute.xlu0 %348  ;;  %1022 = vperm.xlu2 %1336, %v1000_v60   ;;  %v442_v60 = vmul.f32 %v1550_v45, %v1580_v2  ;;  %v444_v2 = vmul.f32 %v1550_v45, %v1640_v57 }
  0xbd   : > { %728 = vperm.xlu1 %1337, %v698_v61   ;;  %v585_v61 = vmul.f32 %v1562_v52, %v1598_v13  ;;  %v387_v3 = vmul.f32 %v1552_v46, %v349_v5  ;;  %v462_v13 = vadd.f32 %v446_v21, %v392_v55 }
  0xbf   : > { %v642_v15 = vpop.permute.xlu1 %641 }
  0xc0   : > { %v661_v16 = vadd.f32 %v642_v15, %v605_v28  ;;  %v662_v20 = vadd.f32 %v642_v15, %v606_v8  ;;  %v388_v28 = vmul.f32 %v1554_v47, %v349_v5  ;;  %v516_v5 = vmul.f32 %v1558_v49, %v1606_v18 }
  0xc1   : > { %v584_v18 = vmul.f32 %v1564_v53, %v1569_v56 }
  0xc2   : > { %v677_v24 = vmax.f32 %v661_v16, 0.0  ;;  %v678_v27 = vmax.f32 %v662_v20, 0.0 }
  0xc3   : > { %v549_v39 = vpop.permute.xlu2 %548 }
  0xc4   : > { %v339_v19 = vpop.permute.xlu0 %338  ;;  %1037 = vperm.xlu2 %1336, %v1003_v22   ;;  %v719_v35 = vpack.c.bf16 %v679_v29, %v677_v24  ;;  %v720_v36 = vpack.c.bf16 %v680_v30, %v678_v27  ;;  %v514_v24 = vmul.f32 %v1558_v49, %v1622_v33  ;;  %v460_v27 = vadd.f32 %v444_v2, %v390_v0 }
  0xc5   : > { %v383_v37 = vmul.f32 %v1552_v46, %v339_v19  ;;  %v384_v38 = vmul.f32 %v1554_v47, %v339_v19  ;;  %1032 = vperm.xlu1 %1337, %v1002_v10   ;;  %v457_v10 = vadd.f32 %v441_v25, %v387_v3  ;;  %v531_v30 = vadd.f32 %v515_v62, %v461_v17 }
  0xc6   : > { %870 = vmatpush.bf16.msra.mxu0 %v719_v35  ;;  %1272 = vmatpush.bf16.msra.mxu2 %v719_v35  ;;  %v529_v19 = vadd.f32 %v513_v1, %v459_v4  ;;  %v532_v35 = vadd.f32 %v516_v5, %v462_v13  ;;  %v530_v33 = vadd.f32 %v514_v24, %v460_v27 }
  0xc7   : > { %v1668_v40 = vadd.f32 %v437_v32, %v383_v37  ;;  %v1670_v31 = vadd.f32 %v438_v34, %v384_v38  ;;  %919 = vmatpush.bf16.msra.mxu1 %v720_v36  ;;  %1276 = vmatpush.bf16.msra.mxu3 %v720_v36  ;;  %v581_v32 = vmul.f32 %v1562_v52, %v549_v39 }
  0xc8   : > { %v479_v41 = vpop.permute.xlu1 %478  ;;  %v602_v58 = vadd.f32 %v586_v43, %v532_v35  ;;  %v599_v21 = vadd.f32 %v583_v59, %v529_v19  ;;  %v1263_v19 = vld [vmem:[%s1873_s3 + $0x8] sm:$0xff]  ;;  %v1269_v35 = vld [vmem:[%s1873_s3 + $0x38] sm:$0xff] }
  0xc9   : > { %v511_v8 = vmul.f32 %v1556_v48, %v479_v41  ;;  %v512_v9 = vmul.f32 %v1558_v49, %v479_v41  ;;  %v601_v41 = vadd.f32 %v585_v61, %v531_v30 }
  0xcb   : > { %v527_v34 = vadd.f32 %v511_v8, %v457_v10 }
  0xcc   : > { %v637_v42 = vpop.permute.xlu2 %636 }
  0xcd   : > { %v659_v51 = vadd.f32 %v637_v42, %v1585_v6  ;;  %v660_v54 = vadd.f32 %v637_v42, %v1587_v7  ;;  %v597_v55 = vadd.f32 %v581_v32, %v527_v34 }
  0xcf   : > { %v675_v56 = vmax.f32 %v659_v51, 0.0  ;;  %v676_v2 = vmax.f32 %v660_v54, 0.0 }
  0xd1   : > { %v344_v50 = vpop.permute.xlu1 %343 }
  0xd2   : > { %v385_v14 = vmul.f32 %v1552_v46, %v344_v50  ;;  %v386_v26 = vmul.f32 %v1554_v47, %v344_v50  ;;  %v458_v46 = vadd.f32 %v442_v60, %v388_v28  ;;  %v627_v50 = vpop.permute.xlu0 %626 }
  0xd3   : > { %v655_v0 = vadd.f32 %v627_v50, %v599_v21 }
  0xd5   : > { %v475_v63 = vpop.permute.xlu2 %474  ;;  %v671_v42 = vmax.f32 %v655_v0, 0.0 }
  0xd6   : > { %v509_v16 = vmul.f32 %v1556_v48, %v475_v63  ;;  %v510_v57 = vmul.f32 %v1558_v49, %v475_v63  ;;  %v600_v63 = vadd.f32 %v584_v18, %v530_v33 }
  0xd8   : > { %v656_v17 = vadd.f32 %v627_v50, %v600_v63 }
  0xda   : > { %v405_v15 = vpop.permute.xlu1 %404  ;;  %v672_v59 = vmax.f32 %v656_v17, 0.0  ;;  %v1770_v18 = vpop.permute.xlu0 %783 }
  0xdb   : > { %v439_v20 = vmul.f32 %v1548_v44, %v405_v15  ;;  %v440_v22 = vmul.f32 %v1550_v45, %v405_v15  ;;  %v582_v44 = vmul.f32 %v1564_v53, %v549_v39  ;;  %v528_v45 = vadd.f32 %v512_v9, %v458_v46 }
  0xdd   : > { %v455_v29 = vadd.f32 %v439_v20, %v385_v14  ;;  %v456_v47 = vadd.f32 %v440_v22, %v386_v26  ;;  %v598_v25 = vadd.f32 %v582_v44, %v528_v45  ;;  %v1264_v44 = vld [vmem:[%s1873_s3 + $0x10] sm:$0xff]  ;;  %v1265_v45 = vld [vmem:[%s1873_s3 + $0x18] sm:$0xff] }
  0xde   : > { %v622_v38 = vpop.permute.xlu2 %621 }
  0xdf   : > { %v525_v36 = vadd.f32 %v509_v16, %v455_v29  ;;  %v526_v37 = vadd.f32 %v510_v57, %v456_v47  ;;  %v653_v39 = vadd.f32 %v622_v38, %v597_v55  ;;  %v654_v1 = vadd.f32 %v622_v38, %v598_v25 }
  0xe1   : > { %v669_v13 = vmax.f32 %v653_v39, 0.0  ;;  %v670_v7 = vmax.f32 %v654_v1, 0.0 }
  0xe2   : > { %v1774_v38 = vpop.permute.xlu0 %778 }
  0xe3   : > { %v632_v60 = vpop.permute.xlu1 %631  ;;  %v715_v43 = vpack.c.bf16 %v671_v42, %v669_v13  ;;  %v716_v8 = vpack.c.bf16 %v672_v59, %v670_v7 }
  0xe4   : > { %v657_v62 = vadd.f32 %v632_v60, %v601_v41  ;;  %v658_v23 = vadd.f32 %v632_v60, %v602_v58 }
  0xe6   : > { %v673_v3 = vmax.f32 %v657_v62, 0.0  ;;  %v674_v61 = vmax.f32 %v658_v23, 0.0 }
  0xe8   : > { %v717_v6 = vpack.c.bf16 %v675_v56, %v673_v3  ;;  %v718_v4 = vpack.c.bf16 %v676_v2, %v674_v61 }
  0xea   : > { %871 = vmatpush.bf16.msra.mxu0 %v717_v6  ;;  %1273 = vmatpush.bf16.msra.mxu2 %v717_v6  ;;  %v1778_v51 = vpop.permute.xlu0 %753 }
  0xeb   : > { %920 = vmatpush.bf16.msra.mxu1 %v718_v4  ;;  %1277 = vmatpush.bf16.msra.mxu3 %v718_v4 }
  0xed   : > { %v471_v28 = vpop.permute.xlu1 %470 }
  0xee   : > { %v507_v9 = vmul.f32 %v1556_v48, %v471_v28  ;;  %v508_v14 = vmul.f32 %v1558_v49, %v471_v28  ;;  %872 = vmatpush.bf16.msra.mxu0 %v715_v43  ;;  %1274 = vmatpush.bf16.msra.mxu2 %v715_v43  ;;  %v617_v49 = vpop.permute.xlu2 %616 }
  0xef   : > { %921 = vmatpush.bf16.msra.mxu1 %v716_v8  ;;  %1278 = vmatpush.bf16.msra.mxu3 %v716_v8 }
  0xf0   : > { %v523_v26 = vadd.f32 %v507_v9, %v1668_v40  ;;  %v524_v15 = vadd.f32 %v508_v14, %v1670_v31 }
  0xf2   : > { %v593_v16 = vadd.f32 %v1593_v11, %v523_v26  ;;  %v594_v57 = vadd.f32 %v1596_v12, %v524_v15  ;;  %v1267_v12 = vld [vmem:[%s1873_s3 + $0x28] sm:$0xff]  ;;  %v1784_v58 = vpop.permute.xlu0 %748 }
  0xf6   : > { %v545_v20 = vpop.permute.xlu1 %544  ;;  %v799_v50 = vpop.permute.xlu2 %798 }
  0xf7   : > { %v579_v22 = vmul.f32 %v1562_v52, %v545_v20  ;;  %v580_v5 = vmul.f32 %v1564_v53, %v545_v20  ;;  %v1262_v52 = vld [vmem:[%s1873_s3] sm:$0xff]  ;;  %v1268_v53 = vld [vmem:[%s1873_s3 + $0x30] sm:$0xff] }
  0xf9   : > { %v595_v48 = vadd.f32 %v579_v22, %v525_v36  ;;  %v596_v24 = vadd.f32 %v580_v5, %v526_v37  ;;  %v1266_v36 = vld [vmem:[%s1873_s3 + $0x20] sm:$0xff] }
  0xfa   : > { %v724_v62 = vpop.permute.xlu0 %723 }
  0xfb   : > { %v651_v27 = vadd.f32 %v617_v49, %v595_v48  ;;  %v652_v10 = vadd.f32 %v617_v49, %v596_v24 }
  0xfd   : > { %v667_v31 = vmax.f32 %v651_v27, 0.0  ;;  %v668_v32 = vmax.f32 %v652_v10, 0.0 }
  0xfe   : > { %v1782_v55 = vpop.permute.xlu2 %773 }
  0xff   : > { %v612_v46 = vpop.permute.xlu1 %611 }
 0x100   : > { %v649_v29 = vadd.f32 %v612_v46, %v593_v16  ;;  %v650_v47 = vadd.f32 %v612_v46, %v594_v57 }
 0x102   : > { %v665_v40 = vmax.f32 %v649_v29, 0.0  ;;  %v666_v30 = vmax.f32 %v650_v47, 0.0 }
 0x104   : > { %v713_v11 = vpack.c.bf16 %v667_v31, %v665_v40  ;;  %v714_v34 = vpack.c.bf16 %v668_v32, %v666_v30 }
 0x106   : > { %873 = vmatpush.bf16.msra.mxu0 %v713_v11  ;;  %1275 = vmatpush.bf16.msra.mxu2 %v713_v11  ;;  %v1788_v39 = vpop.permute.xlu2 %768 }
 0x107   : > { %922 = vmatpush.bf16.msra.mxu1 %v714_v34  ;;  %1279 = vmatpush.bf16.msra.mxu3 %v714_v34  ;;  %v1768_v37 = vpop.permute.xlu1 %793 }
 0x109   : > { %1234 = vmatmul.msk.bf16.vlgmr.msra.gmra.mxu0 %vm841_vm0, %v1262_v52  ;;  %1240 = vmatmul.msk.bf16.vlgmr.msra.gmra.mxu2 %vm841_vm0, %v1268_v53 }
 0x10a   : > { %1242 = vmatmul.msk.bf16.vlgmr.msra.gmra.mxu1 %vm841_vm0, %v1262_v52  ;;  %1247 = vmatmul.msk.bf16.vlgmr.msra.gmra.mxu3 %vm841_vm0, %v1267_v12 }
 0x10e   : > { %v1792_v59 = vpop.permute.xlu2 %743 }
 0x10f   : > { %v1772_v33 = vpop.permute.xlu1 %788 }
 0x116   : > { %v1799_v57 = vpop.permute.xlu2 %738 }
 0x117   : > { %v1776_v41 = vpop.permute.xlu1 %763 }
 0x119   : > { %1235 = vmatmul.msk.bf16.gmra.mxu0 %vm841_vm0, %v1263_v19  ;;  %1241 = vmatmul.msk.bf16.gmra.mxu2 %vm841_vm0, %v1269_v35 }
 0x11a   : > { %1243 = vmatmul.msk.bf16.gmra.mxu1 %vm841_vm0, %v1263_v19  ;;  %1248 = vmatmul.msk.bf16.gmra.mxu3 %vm841_vm0, %v1268_v53 }
 0x11f   : > { %v1780_v54 = vpop.permute.xlu1 %758 }
 0x127   : > { %v1786_v21 = vpop.permute.xlu1 %733 }
 0x129   : > { %1236 = vmatmul.msk.bf16.gmra.mxu0 %vm841_vm0, %v1264_v44 }
 0x12a   : > { %1244 = vmatmul.msk.bf16.gmra.mxu1 %vm841_vm0, %v1264_v44  ;;  %1249 = vmatmul.msk.bf16.gmra.mxu3 %vm841_vm0, %v1269_v35 }
 0x12f   : > { %v729_v1 = vpop.permute.xlu1 %728 }
 0x139   : > { %1237 = vmatmul.msk.bf16.gmra.mxu0 %vm841_vm0, %v1265_v45 }
 0x13a   : > { %1245 = vmatmul.msk.bf16.gmra.mxu1 %vm841_vm0, %v1265_v45 }
 0x149   : > { %1238 = vmatmul.msk.bf16.gmra.mxu0 %vm841_vm0, %v1266_v36 }
 0x14a   : > { %1246 = vmatmul.msk.bf16.gmra.mxu1 %vm841_vm0, %v1266_v36 }
 0x159   : > { %1239 = vmatmul.msk.bf16.gmra.mxu0 %vm841_vm0, %v1267_v12 }
 0x186   : > { %v875_v25 = vpop.f32.mrf.mxu0 }
 0x187   : > { %v924_v60 = vpop.f32.mrf.mxu1  ;;  %v876_v63 = vadd.f32 %v875_v25, %v724_v62 }
 0x188   : > { %v925_v56 = vadd.f32 %v924_v60, %v724_v62 }
 0x189   : > { %v964_v13 = vmax.f32 %v876_v63, 0.0 }
 0x18a   : > { %v965_v4 = vmax.f32 %v925_v56, 0.0 }
 0x18c   : > { %v905_v23 = vpop.f32.mrf.mxu2 }
 0x18d   : > { %v949_v0 = vpop.f32.mrf.mxu3  ;;  %v906_v30 = vadd.f32 %v905_v23, %v1770_v18 }
 0x18e   : > { %v877_v2 = vpop.f32.mrf.mxu0 }
 0x18f   : > { %v878_v3 = vadd.f32 %v877_v2, %v729_v1  ;;  %v926_v61 = vpop.f32.mrf.mxu1  ;;  %v988_v53 = vmax.f32 %v906_v30, 0.0 }
 0x190   : > { %v927_v17 = vadd.f32 %v926_v61, %v729_v1 }
 0x191   : > { %v966_v6 = vmax.f32 %v878_v3, 0.0 }
 0x192   : > { %v967_v7 = vmax.f32 %v927_v17, 0.0  ;;  %v950_v17 = vadd.f32 %v949_v0, %v1782_v55 }
 0x193   : > { %v1790_v42 = vpack.c.bf16 %v966_v6, %v964_v13 }
 0x194   : > { %v907_v43 = vpop.f32.mrf.mxu2  ;;  %v1794_v28 = vpack.c.bf16 %v967_v7, %v965_v4 }
 0x195   : > { %v951_v8 = vpop.f32.mrf.mxu3  ;;  %v908_v46 = vadd.f32 %v907_v43, %v1772_v33 }
 0x196   : > { %v880_v9 = vpop.f32.mrf.mxu0  ;;  %v952_v2 = vadd.f32 %v951_v8, %v1774_v38 }
 0x197   : > { %v1796_v14 = vpop.f32.mrf.mxu1  ;;  %v881_v15 = vadd.f32 %v880_v9, %v1786_v21  ;;  %v990_v34 = vmax.f32 %v908_v46, 0.0 }
 0x198   : > { %v987_v6 = vmax.f32 %v952_v2, 0.0 }
 0x199   : > { %v968_v48 = vmax.f32 %v881_v15, 0.0  ;;  %v1016_v19 = vpack.c.bf16 %v990_v34, %v988_v53 }
 0x19c   : > { %v910_v26 = vpop.f32.mrf.mxu2 }
 0x19d   : > { %v954_v16 = vpop.f32.mrf.mxu3  ;;  %v911_v49 = vadd.f32 %v910_v26, %v1768_v37 }
 0x19e   : > { %v882_v20 = vpop.f32.mrf.mxu0  ;;  %v955_v63 = vadd.f32 %v954_v16, %v1770_v18 }
 0x19f   : > { %v883_v22 = vadd.f32 %v882_v20, %v1799_v57  ;;  %v1802_v5 = vpop.f32.mrf.mxu1  ;;  %v992_v31 = vmax.f32 %v911_v49, 0.0 }
 0x1a0   : > { %v989_v13 = vmax.f32 %v955_v63, 0.0 }
 0x1a1   : > { %v970_v24 = vmax.f32 %v883_v22, 0.0 }
 0x1a3   : > { %v1805_v27 = vpack.c.bf16 %v970_v24, %v968_v48 }
 0x1a4   : > { %v912_v10 = vpop.f32.mrf.mxu2 }
 0x1a5   : > { %v913_v29 = vadd.f32 %v912_v10, %v799_v50  ;;  %v956_v47 = vpop.f32.mrf.mxu3 }
 0x1a6   : > { %v1808_v40 = vpop.f32.mrf.mxu0  ;;  %v957_v25 = vadd.f32 %v956_v47, %v1772_v33  ;;  %v985_v33 = vmax.f32 %v950_v17, 0.0  ;;  %v932_v47 = vadd.f32 %v1802_v5, %v1799_v57  ;;  %v1033_v17 = vpop.permute.xlu1 %1032 }
 0x1a7   : > { %v994_v32 = vmax.f32 %v913_v29, 0.0  ;;  %v934_v11 = vpop.f32.mrf.mxu1 }
 0x1a8   : > { %v991_v3 = vmax.f32 %v957_v25, 0.0  ;;  %v935_v10 = vadd.f32 %v934_v11, %v1792_v59 }
 0x1a9   : > { %v1018_v52 = vpack.c.bf16 %v994_v32, %v992_v31  ;;  %v930_v32 = vadd.f32 %v1796_v14, %v1786_v21 }
 0x1aa   : > { %v1017_v4 = vpack.c.bf16 %v991_v3, %v989_v13  ;;  %v973_v34 = vmax.f32 %v935_v10, 0.0 }
 0x1ab   : > { %1052 = vmatpush.bf16.msrb.mxu2 %v1018_v52  ;;  %v971_v52 = vmax.f32 %v932_v47, 0.0 }
 0x1ad   : > { %v959_v12 = vpop.f32.mrf.mxu3 }
 0x1ae   : > { %v1811_v35 = vpop.f32.mrf.mxu0  ;;  %v960_v45 = vadd.f32 %v959_v12, %v1768_v37 }
 0x1af   : > { %v936_v44 = vpop.f32.mrf.mxu1  ;;  %1053 = vmatpush.bf16.msrb.mxu2 %v1016_v19  ;;  %v969_v19 = vmax.f32 %v930_v32, 0.0 }
 0x1b0   : > { %v993_v1 = vmax.f32 %v960_v45, 0.0  ;;  %v937_v48 = vadd.f32 %v936_v44, %v1784_v58 }
 0x1b2   : > { %v975_v30 = vmax.f32 %v937_v48, 0.0 }
 0x1b4   : > { %v1009_v53 = vpack.c.bf16 %v975_v30, %v973_v34 }
 0x1b5   : > { %v961_v36 = vpop.f32.mrf.mxu3 }
 0x1b6   : > { %v962_v60 = vadd.f32 %v961_v36, %v799_v50  ;;  %v890_v62 = vpop.f32.mrf.mxu0  ;;  %v1015_v50 = vpack.c.bf16 %v987_v6, %v985_v33  ;;  %v1007_v36 = vpack.c.bf16 %v971_v52, %v969_v19 }
 0x1b7   : > { %v939_v23 = vpop.f32.mrf.mxu1 }
 0x1b8   : > { %v995_v56 = vmax.f32 %v962_v60, 0.0  ;;  %v940_v16 = vadd.f32 %v939_v23, %v1778_v51  ;;  %v891_v23 = vadd.f32 %v890_v62, %v1778_v51 }
 0x1ba   : > { %v1019_v61 = vpack.c.bf16 %v995_v56, %v993_v1  ;;  %v977_v46 = vmax.f32 %v940_v16, 0.0  ;;  %v976_v1 = vmax.f32 %v891_v23, 0.0 }
 0x1bc   : > { %1071 = vmatpush.bf16.msrb.mxu3 %v1019_v61 }
 0x1be   : > { %v892_v37 = vpop.f32.mrf.mxu0 }
 0x1bf   : > { %v941_v7 = vpop.f32.mrf.mxu1  ;;  %v893_v21 = vadd.f32 %v892_v37, %v1780_v54 }
 0x1c0   : > { %1072 = vmatpush.bf16.msrb.mxu3 %v1017_v4  ;;  %v942_v15 = vadd.f32 %v941_v7, %v1780_v54  ;;  %v886_v54 = vadd.f32 %v1808_v40, %v1792_v59  ;;  %v1023_v59 = vpop.permute.xlu2 %1022 }
 0x1c2   : > { %v979_v24 = vmax.f32 %v942_v15, 0.0  ;;  %v972_v56 = vmax.f32 %v886_v54, 0.0 }
 0x1c4   : > { %1073 = vmatpush.bf16.msrb.mxu3 %v1015_v50  ;;  %v1011_v31 = vpack.c.bf16 %v979_v24, %v977_v46 }
 0x1c6   : > { %v895_v43 = vpop.f32.mrf.mxu0 }
 0x1c7   : > { %v944_v18 = vpop.f32.mrf.mxu1  ;;  %v896_v57 = vadd.f32 %v895_v43, %v1776_v41 }
 0x1c8   : > { %v945_v9 = vadd.f32 %v944_v18, %v1776_v41  ;;  %v978_v41 = vmax.f32 %v893_v21, 0.0  ;;  %v1038_v50 = vpop.permute.xlu2 %1037 }
 0x1ca   : > { %v981_v20 = vmax.f32 %v945_v9, 0.0  ;;  %v1010_v62 = vpack.c.bf16 %v978_v41, %v976_v1 }
 0x1ce   : > { %v897_v26 = vpop.f32.mrf.mxu0 }
 0x1cf   : > { %v946_v8 = vpop.f32.mrf.mxu1  ;;  %v898_v44 = vadd.f32 %v897_v26, %v1788_v39 }
 0x1d0   : > { %v947_v0 = vadd.f32 %v946_v8, %v1788_v39  ;;  %v1270_v39 = vld [vmem:[%s1875_s5] sm:$0xff] }
 0x1d1   : > { %v982_v14 = vmax.f32 %v898_v44, 0.0 }
 0x1d2   : > { %v983_v22 = vmax.f32 %v947_v0, 0.0 }
 0x1d4   : > { %v1013_v49 = vpack.c.bf16 %v983_v22, %v981_v20 }
 0x1d6   : > { %1074 = vmatpush.bf16.msrb.mxu3 %v1013_v49  ;;  %v900_v29 = vpop.f32.mrf.mxu0 }
 0x1d7   : > { %v901_v12 = vadd.f32 %v900_v29, %v1782_v55  ;;  %v980_v55 = vmax.f32 %v896_v57, 0.0 }
 0x1d9   : > { %v984_v5 = vmax.f32 %v901_v12, 0.0  ;;  %v1012_v63 = vpack.c.bf16 %v982_v14, %v980_v55 }
 0x1da   : > { %1075 = vmatpush.bf16.msrb.mxu3 %v1011_v31 }
 0x1de   : > { %1076 = vmatpush.bf16.msrb.mxu3 %v1009_v53  ;;  %v902_v11 = vpop.f32.mrf.mxu0 }
 0x1df   : > { %v903_v45 = vadd.f32 %v902_v11, %v1774_v38  ;;  %v888_v38 = vadd.f32 %v1811_v35, %v1784_v58  ;;  %v1271_v58 = vld [vmem:[%s1875_s5 + $0x8] sm:$0xff]  ;;  %v1028_v35 = vpop.permute.xlu0 %1027 }
 0x1e1   : > { %v986_v25 = vmax.f32 %v903_v45, 0.0  ;;  %v974_v51 = vmax.f32 %v888_v38, 0.0 }
 0x1e2   : > { %1077 = vmatpush.bf16.msrb.mxu3 %v1007_v36 }
 0x1e3   : > { %v1014_v60 = vpack.c.bf16 %v986_v25, %v984_v5  ;;  %v1008_v2 = vpack.c.bf16 %v974_v51, %v972_v56 }
 0x1e5   : > { %1054 = vmatpush.bf16.msrb.mxu2 %v1014_v60 }
 0x1e6   : > { %1078 = vmatpush.bf16.msrb.mxu3 %v1794_v28 }
 0x1e9   : > { %1079 = vmatmul.bf16.vlgmr.msrb.gmra.mxu3 %v1270_v39  ;;  %1055 = vmatpush.bf16.msrb.mxu2 %v1012_v63 }
 0x1ed   : > { %1056 = vmatpush.bf16.msrb.mxu2 %v1010_v62 }
 0x1f1   : > { %1057 = vmatpush.bf16.msrb.mxu2 %v1008_v2 }
 0x1f5   : > { %1058 = vmatpush.bf16.msrb.mxu2 %v1805_v27 }
 0x1f9   : > { %1084 = vmatmul.bf16.gmra.mxu3 %v1271_v58  ;;  %1059 = vmatpush.bf16.msrb.mxu2 %v1790_v42 }
 0x1fc   : > { %1060 = vmatmul.bf16.vlgmr.msrb.gmra.mxu2 %v1270_v39 }
 0x20c   : > { %1065 = vmatmul.bf16.gmra.mxu2 %v1271_v58 }
 0x26c   : > { %v1080_v28 = vpop.f32.mrf.mxu3 }
 0x26d   : > { %v1081_v40 = vadd.f32 %v1080_v28, %v1023_v59 }
 0x26f   : > { %v1091_v27 = vmax.f32 %v1081_v40, 0.0 }
 0x271   : > { %1099 = vst [vmem:[%s1851_s9 + $0x8] sm:$0xff] %v1091_v27 }
 0x274   : > { %v1082_v3 = vpop.f32.mrf.mxu3 }
 0x275   : > { %v1083_v42 = vadd.f32 %v1082_v3, %v1028_v35 }
 0x277   : > { %v1093_v61 = vmax.f32 %v1083_v42, 0.0 }
 0x279   : > { %1101 = vst [vmem:[%s1851_s9 + $0x18] sm:$0xff] %v1093_v61 }
 0x27c   : > { %v1085_v13 = vpop.f32.mrf.mxu3 }
 0x27d   : > { %v1086_v6 = vadd.f32 %v1085_v13, %v1033_v17 }
 0x27f   : > { %v1095_v37 = vmax.f32 %v1086_v6, 0.0  ;;  %v1061_v4 = vpop.f32.mrf.mxu2 }
 0x280   : > { %v1062_v7 = vadd.f32 %v1061_v4, %v1023_v59 }
 0x281   : > { %1103 = vst [vmem:[%s1851_s9 + $0x28] sm:$0xff] %v1095_v37 }
 0x282   : > { %v1090_v33 = vmax.f32 %v1062_v7, 0.0 }
 0x284   : > { %1098 = vst [vmem:[%s1851_s9] sm:$0xff] %v1090_v33  ;;  %v1087_v43 = vpop.f32.mrf.mxu3 }
 0x285   : > { %v1088_v18 = vadd.f32 %v1087_v43, %v1038_v50 }
 0x287   : > { %v1097_v9 = vmax.f32 %v1088_v18, 0.0  ;;  %v1063_v26 = vpop.f32.mrf.mxu2 }
 0x288   : > { %v1064_v8 = vadd.f32 %v1063_v26, %v1028_v35 }
 0x289   : > { %1105 = vst [vmem:[%s1851_s9 + $0x38] sm:$0xff] %v1097_v9 }
 0x28a   : > { %v1092_v15 = vmax.f32 %v1064_v8, 0.0 }
 0x28c   : > { %1100 = vst [vmem:[%s1851_s9 + $0x10] sm:$0xff] %v1092_v15 }
 0x28f   : > { %v1066_v0 = vpop.f32.mrf.mxu2 }
 0x290   : > { %v1067_v16 = vadd.f32 %v1066_v0, %v1033_v17 }
 0x292   : > { %v1094_v20 = vmax.f32 %v1067_v16, 0.0 }
 0x294   : > { %1102 = vst [vmem:[%s1851_s9 + $0x20] sm:$0xff] %v1094_v20 }
 0x297   : > { %v1068_v22 = vpop.f32.mrf.mxu2 }
 0x298   : > { %v1069_v48 = vadd.f32 %v1068_v22, %v1038_v50 }
 0x29a   : > { %v1096_v24 = vmax.f32 %v1069_v48, 0.0 }
 0x29c   : > { %1104 = vst [vmem:[%s1851_s9 + $0x30] sm:$0xff] %v1096_v24 }
 0x29d PF: > { %s17_s26 = sadd.s32 1, %s1360_s26   ;;  %s1878_s24 = smov %s1356_s25 }
 0x29e   : > { %p14_p5 = scmp.ge.s32.totalorder %s17_s26, 4   ;;  %s1879_s25 = smov %s1881_s27 }
 0x2a0   :  { %16 = sbr.rel (!%p14_p5) target bundleno = 2 (0x2), region = 78 }

</bundles_post_ra>
